<compile_context>
chip_gen: v5e
topology: v5e:2x2
jax: 0.10.0
libtpu: 0.0.40
codegen_flags: <defaults>
</compile_context>

<pallas_src>
import jax
import jax.numpy as jnp
from jax.experimental import pallas as pl
from jax.experimental.pallas import tpu as pltpu

_LANE = 128
_MAX_LANE_WIDTH = 2048                      # 16 vregs wide; keeps rows tileable
_BLOCK_BYTE_BUDGET = 8 * 1024 * 1024        # ~8 MiB per block (per buffer)
_VMEM_LIMIT_BYTES = 48 * 1024 * 1024        # in+out double-buffered << 64 MiB (v7x)


def _identity_kernel(x_ref, o_ref):
    # Entire "forward" of NoneModule is `return x`.
    o_ref[...] = x_ref[...]


def _copy_2d(x2: jax.Array, tile_rows: int, donate: bool) -> jax.Array:
    rows, lanes = x2.shape
    nbytes = x2.size * x2.dtype.itemsize
    extra = {"input_output_aliases": {0: 0}} if donate else {}
    return pl.pallas_call(
        _identity_kernel,
        out_shape=jax.ShapeDtypeStruct((rows, lanes), x2.dtype),
        grid=(pl.cdiv(rows, tile_rows),),
        in_specs=[pl.BlockSpec((tile_rows, lanes), lambda i: (i, 0))],
        out_specs=pl.BlockSpec((tile_rows, lanes), lambda i: (i, 0)),
        cost_estimate=pl.CostEstimate(
            flops=0, transcendentals=0, bytes_accessed=2 * nbytes),
        compiler_params=pltpu.CompilerParams(
            dimension_semantics=("parallel",),
            vmem_limit_bytes=_VMEM_LIMIT_BYTES,
        ),
        **extra,
    )(x2)


def _pick_lane_width(total: int) -> int:
    """Largest multiple of 128 (capped) dividing `total`, preferring >=8 rows."""
    best_any = 0
    for k in range(_MAX_LANE_WIDTH // _LANE, 0, -1):
        w = k * _LANE
        if total % w == 0:
            if best_any == 0:
                best_any = w
            if total // w >= 8:
                return w
    return best_any


def _pick_tile_rows(rows: int, lanes: int, itemsize: int) -> int:
    """Byte-budgeted, multiple-of-8 tile rows; split so grid >= 2 if possible."""
    if rows < 8:
        return rows  # full leading dim (block == full array dims is legal)
    budget_rows = max(8, (_BLOCK_BYTE_BUDGET // (lanes * itemsize)) // 8 * 8)
    tile_rows = min(rows // 8 * 8, budget_rows)
    if rows <= tile_rows and rows >= 16:
        # Would collapse to grid=(1,): split so both v7x TensorCores get work.
        half = -(-rows // 2)                 # ceil(rows / 2)
        tile_rows = -(-half // 8) * 8        # round up to multiple of 8
    return max(8, tile_rows)


def none_module_forward(x: jax.Array, *, force_kernel: bool = False,
                        donate: bool = False) -> jax.Array:
    """Identity forward pass of NoneModule.

    Default: pure identity (no kernel, no HBM traffic) -- nothing beats not
    launching a copy.  Set force_kernel=True to materialize the result via a
    Pallas copy kernel (set donate=True only if x's buffer is donated).
    """
    if not force_kernel:
        return x

    if x.ndim == 0 or x.size == 0:
        return x

    orig_shape = x.shape
    total = x.size
    itemsize = x.dtype.itemsize

    lanes = _pick_lane_width(total)
    if lanes > 0:
        # Lane-dense slab: last dim multiple of 128 -> unmasked full-width stores.
        rows = total // lanes
        tile_rows = _pick_tile_rows(rows, lanes, itemsize)
        out = _copy_2d(x.reshape(rows, lanes), tile_rows, donate)
        return out.reshape(orig_shape)

    # Fallback (element count not divisible by 128): keep the original last dim
    # and tile the leading dim (multiple-of-8 rows) so DMA still double-buffers
    # and large arrays never exceed VMEM.
    last = orig_shape[-1]
    lead = total // last
    tile_rows = _pick_tile_rows(lead, last, itemsize)
    out = _copy_2d(x.reshape(lead, last), tile_rows, donate)
    return out.reshape(orig_shape)


if __name__ == "__main__":
    k0, k1, k2 = jax.random.split(jax.random.PRNGKey(0), 3)

    # NCHW input consistent with a conv-style extractor module (in_channel=4).
    x = jax.random.normal(k0, (2, 4, 16, 16), dtype=jnp.float32)

    # Default path: true identity (no kernel launch).
    y_id = none_module_forward(x)
    jax.block_until_ready(y_id)
    assert y_id.shape == x.shape and y_id.dtype == x.dtype
    assert bool(jnp.all(y_id == x))

    # Kernel path on the small input (lane-dense slab, single-tile grid).
    y = none_module_forward(x, force_kernel=True)
    jax.block_until_ready(y)
    assert y.shape == x.shape and y.dtype == x.dtype
    assert bool(jnp.all(y == x))

    # Larger input: multi-tile, double-buffered, grid split across >=2 programs.
    x_big = jax.random.normal(k1, (2, 8, 256, 256), dtype=jnp.float32)
    y_big = none_module_forward(x_big, force_kernel=True)
    jax.block_until_ready(y_big)
    assert y_big.shape == x_big.shape and y_big.dtype == x_big.dtype
    assert bool(jnp.all(y_big == x_big))

    # Fallback path: element count not divisible by 128 (tiled leading dim).
    x_odd = jax.random.normal(k2, (2, 4, 15, 15), dtype=jnp.float32)
    y_odd = none_module_forward(x_odd, force_kernel=True)
    jax.block_until_ready(y_odd)
    assert y_odd.shape == x_odd.shape and y_odd.dtype == x_odd.dtype
    assert bool(jnp.all(y_odd == x_odd))

    print("KERNEL_OK")
</pallas_src>

<mosaic_0001>
module attributes {stable_mosaic.version = 11 : i64} {
  func.func @_identity_kernel(%arg0: i32, %arg1: memref<8x256xf32, #tpu.memory_space<vmem>>, %arg2: memref<8x256xf32, #tpu.memory_space<vmem>>) attributes {dimension_semantics = [#tpu.dimension_semantics<parallel>], iteration_bounds = array<i64: 1>, scalar_prefetch = 0 : i64, scratch_operands = 0 : i64, tpu.core_type = #tpu.core_type<tc>, window_params = [{transform_indices = @transform_0, window_bounds = array<i64: 8, 256>}, {transform_indices = @transform_1, window_bounds = array<i64: 8, 256>}]} {
    %c0 = arith.constant 0 : index
    %c0_0 = arith.constant 0 : index
    %0 = vector.load %arg1[%c0, %c0_0] : memref<8x256xf32, #tpu.memory_space<vmem>>, vector<8x256xf32>
    %c0_1 = arith.constant 0 : index
    %c0_2 = arith.constant 0 : index
    %1 = vector.load %arg2[%c0_1, %c0_2] : memref<8x256xf32, #tpu.memory_space<vmem>>, vector<8x256xf32>
    tpu.vector_store %arg2[%c0_1, %c0_2], %0 {strides = array<i32>} : memref<8x256xf32, #tpu.memory_space<vmem>>, vector<8x256xf32>,
    return
  }
  func.func @transform_0(%arg0: i32) -> (i32, i32) {
    %c0_i32 = arith.constant 0 : i32
    %c0_i32_0 = arith.constant 0 : i32
    return %arg0, %c0_i32 : i32, i32
  }
  func.func @transform_1(%arg0: i32) -> (i32, i32) {
    %c0_i32 = arith.constant 0 : i32
    %c0_i32_0 = arith.constant 0 : i32
    return %arg0, %c0_i32 : i32, i32
  }
}

</mosaic_0001>

<bundles_post_ra>
// kernel: tpu_custom_call.1
= control target key start
LH: loop header
LB: loop body
LE: loop exit
PB: predicated region body
PF: predicated region fallthrough
CT: control target
= control target key end

     0   :  { %6 = vsyncpa [#allocation3], 0  ;;  %s116_s0 = inlined_call_operand.hbm [shape: f32[8,256], index: 0, kind: input, shape index: {}]   ;;  %s117_s1 = inlined_call_operand.hbm [shape: f32[8,256], index: 1, kind: output, shape index: {}]  }
   0x1   :  { %7 = vsyncpa [#allocation4], 0  ;;  %s13_s8 = sshll.u32 %s116_s0, 4  ;;  %s98_s9 = smov [#allocation2]   ;;  %s14_s8 = int_to_ptr.hbm [resolvable:$true] %s13_s8 }
   0x2   :  { %s15_s10 = sshll.u32 %s98_s9, 4  ;;  %s16_s10 = int_to_ptr.vmem [resolvable:$true] %s15_s10 }
   0x3   :  { %18 = dma.hbm_to_vmem [thread:$0]  %s14_s8, 256, %s16_s10, [#allocation3]  }
   0x4   :  { %94 = dma.done.wait [#allocation3], 256  }
   0x5   :  { %95 = vsyncadd [#allocation3], 4294967040  ;;  %s99_s11 = smov [#allocation5]   ;;  %s34_s15 = sshll.u32 %s117_s1, 4  ;;  %v23_v0 = vld [vmem:[#allocation2] sm:$0xff]  ;;  %v24_v1 = vld [vmem:[#allocation2 + $0x8] sm:$0xff]  ;;  %s35_s15 = int_to_ptr.hbm [resolvable:$true] %s34_s15 }
   0x6   :  { %s32_s12 = sshll.u32 %s99_s11, 4  ;;  %25 = vst [vmem:[#allocation5] sm:$0xff] %v23_v0  ;;  %s33_s12 = int_to_ptr.vmem [resolvable:$true] %s32_s12 }
   0x7   :  { %26 = vst [vmem:[#allocation5 + $0x8] sm:$0xff] %v24_v1 }
   0x8   :  { %37 = dma.vmem_to_hbm [thread:$0]  %s33_s12, 256, %s35_s15, [#allocation4]  }
   0x9   :  { %96 = dma.done.wait [#allocation4], 256  }
   0xa   :  { %97 = vsyncadd [#allocation4], 4294967040 }
   0xb   :  { %42 = vsyncpa [#allocation3], 1 }
   0xc   :  { %43 = vsyncpa [#allocation4], 1 }

</bundles_post_ra>
